<compile_context>
chip_gen: v6e
topology: v6e:2x2x1
jax: 0.10.0
libtpu: 0.0.40
codegen_flags: <defaults>
</compile_context>

<pallas_src>
import functools
import math

import jax
import jax.numpy as jnp
from jax.experimental import pallas as pl
from jax.experimental.pallas import tpu as pltpu

NEG_SLOPE = 0.01          # F.leaky_relu default negative_slope
PI = math.pi
VMEM_BUDGET = 48 * 1024 * 1024   # conservative: fits v7x's 64 MiB physical VMEM


def _round_up(n, m):
    return ((n + m - 1) // m) * m


def _leaky_relu(x):
    # Identical to the compare+select form for slope in (0, 1).
    return jnp.maximum(x, jnp.float32(NEG_SLOPE) * x)


def _spn_tanh_kernel(x_ref, w1, b1, w2, b2, wo, bo, o_ref):
    cdt = w1.dtype  # matmul operand dtype (weights pre-cast in the wrapper)

    # fc1 + leaky_relu
    h = jnp.dot(x_ref[...].astype(cdt), w1[...],
                preferred_element_type=jnp.float32) + b1[...]
    h = _leaky_relu(h)
    # fc2 + leaky_relu
    h = jnp.dot(h.astype(cdt), w2[...],
                preferred_element_type=jnp.float32) + b2[...]
    h = _leaky_relu(h)
    # olayer, then tanh * pi
    o = jnp.dot(h.astype(cdt), wo[...],
                preferred_element_type=jnp.float32) + bo[...]
    o_ref[...] = (jnp.tanh(o) * jnp.float32(PI)).astype(o_ref.dtype)


def _pick_block_b(B, F_in, h_size, d_out, block_b, w_itemsize):
    """Batch tile from the VMEM budget; >=2 grid steps when batch allows."""
    weight_bytes = ((F_in * h_size + h_size * h_size + h_size * d_out) * w_itemsize
                    + (h_size + h_size + d_out) * 4)          # biases f32
    # Per batch-row VMEM: double-buffered x (f32 in), double-buffered out (f32),
    # f32 intermediates (~2x h_size) and the bf16 operand copies.
    per_row = (2 * F_in * 4 + 2 * d_out * 4 + 2 * h_size * 4
               + (F_in + 2 * h_size) * w_itemsize)
    avail = int(VMEM_BUDGET * 0.8) - weight_bytes
    blk_cap = max(8, (avail // max(per_row, 1)) // 8 * 8)

    blk = min(block_b, blk_cap, _round_up(B, 8))
    if B >= 16:
        # Keep at least two grid steps so both v7x TensorCores get work.
        blk = min(blk, _round_up(pl.cdiv(B, 2), 8))
    blk = max(8, _round_up(blk, 8))
    return blk, weight_bytes, per_row


def semantic_pointer_network_tanh(x, params, *, block_b=512,
                                  matmul_dtype=jnp.bfloat16):
    """Fused SPN-Tanh forward: (B, num_features) -> (B, dims)."""
    B, F_in = x.shape
    h_size = params["w1"].shape[1]
    dims = params["wo"].shape[1]

    # One-time host-side cast of the weight matrices to the matmul dtype.
    w1 = params["w1"].astype(matmul_dtype)
    w2 = params["w2"].astype(matmul_dtype)
    wo = params["wo"].astype(matmul_dtype)
    b1, b2, bo = params["b1"], params["b2"], params["bo"]   # stay f32

    # Lane-dense output only when the pad inflation is modest (dims >= 64);
    # for tiny dims the masked store is cheaper than 8x writeback + a slice.
    if dims % 128 == 0 or dims < 64:
        d_out, pad_out = dims, False
    else:
        d_out, pad_out = _round_up(dims, 128), True
        wo = jnp.pad(wo, ((0, 0), (0, d_out - dims)))
        bo = jnp.pad(bo, ((0, 0), (0, d_out - dims)))

    w_itemsize = jnp.dtype(matmul_dtype).itemsize
    blk, weight_bytes, per_row = _pick_block_b(
        B, F_in, h_size, d_out, block_b, w_itemsize)
    grid = (pl.cdiv(B, blk),)   # ragged last block handled by Pallas masking

    est_vmem = weight_bytes + per_row * blk
    vmem_limit = int(min(max(est_vmem * 1.5, 32 * 1024 * 1024),
                         60 * 1024 * 1024))

    cost = pl.CostEstimate(
        flops=2 * B * (F_in * h_size + h_size * h_size + h_size * dims),
        transcendentals=B * dims,
        bytes_accessed=(B * F_in * x.dtype.itemsize
                        + weight_bytes + B * d_out * 4),
    )

    def const_spec(arr):
        # Whole array resident in VMEM; constant index_map -> never re-fetched,
        # so a single buffer suffices.
        return pl.BlockSpec(arr.shape, lambda i: (0, 0),
                            pipeline_mode=pl.Buffered(1))

    out = pl.pallas_call(
        _spn_tanh_kernel,
        out_shape=jax.ShapeDtypeStruct((B, d_out), jnp.float32),
        grid_spec=pltpu.PrefetchScalarGridSpec(
            num_scalar_prefetch=0,
            grid=grid,
            in_specs=[
                pl.BlockSpec((blk, F_in), lambda i: (i, 0)),
                const_spec(w1), const_spec(b1),
                const_spec(w2), const_spec(b2),
                const_spec(wo), const_spec(bo),
            ],
            out_specs=pl.BlockSpec((blk, d_out), lambda i: (i, 0)),
        ),
        compiler_params=pltpu.CompilerParams(
            dimension_semantics=("parallel",),
            vmem_limit_bytes=vmem_limit,
        ),
        cost_estimate=cost,
    )(x, w1, b1, w2, b2, wo, bo)

    return out[:, :dims] if pad_out else out


def init_params(key, num_features, h_size, dims):
    """nn.Linear default init (uniform +-1/sqrt(fan_in)); weights stored (in, out)."""
    def linear(k, fan_in, fan_out):
        kw, kb = jax.random.split(k)
        bound = 1.0 / math.sqrt(fan_in)
        w = jax.random.uniform(kw, (fan_in, fan_out), jnp.float32, -bound, bound)
        b = jax.random.uniform(kb, (1, fan_out), jnp.float32, -bound, bound)
        return w, b

    k1, k2, k3 = jax.random.split(key, 3)
    w1, b1 = linear(k1, num_features, h_size)
    w2, b2 = linear(k2, h_size, h_size)        # MUL_FACTOR == 1
    wo, bo = linear(k3, h_size, dims)
    # TODO(synk): p/n circular vectors, create_label_embedding(), inference()
    # and circular_inference() (circular convolution / approximate inverse) are
    # not part of forward() and are not implemented here.
    return dict(w1=w1, b1=b1, w2=w2, b2=b2, wo=wo, bo=bo)


def reference_forward(x, params):
    h = jax.nn.leaky_relu(x @ params["w1"] + params["b1"], NEG_SLOPE)
    h = jax.nn.leaky_relu(h @ params["w2"] + params["b2"], NEG_SLOPE)
    o = h @ params["wo"] + params["bo"]
    return jnp.tanh(o) * PI


if __name__ == "__main__":
    # Small shapes consistent with the module's forward:
    #   x: (batch, num_features), hidden h_size, output: (batch, dims)
    batch, num_features, h_size, dims = 8, 32, 32, 16

    key = jax.random.PRNGKey(0)
    k_x, k_p, k_x2 = jax.random.split(key, 3)
    x = jax.random.normal(k_x, (batch, num_features), jnp.float32)
    params = init_params(k_p, num_features, h_size, dims)
    ref = reference_forward(x, params)

    # Default path: bf16 matmul operands, f32 accumulation (all TPU gens).
    out_bf16 = semantic_pointer_network_tanh(x, params)
    out_bf16 = jax.block_until_ready(out_bf16)
    assert out_bf16.shape == (batch, dims)
    err_bf16 = float(jnp.max(jnp.abs(out_bf16 - ref)))
    assert err_bf16 < 0.15, f"bf16 path: max abs error {err_bf16}"

    # Full-precision operand path.
    out_f32 = semantic_pointer_network_tanh(x, params,
                                            matmul_dtype=jnp.float32)
    out_f32 = jax.block_until_ready(out_f32)
    err_f32 = float(jnp.max(jnp.abs(out_f32 - ref)))
    assert err_f32 < 2e-3, f"f32 path: max abs error {err_f32}"

    # Ragged batch (not a tile multiple): exercises the masked last block and
    # the >=2 grid-step rule without any host-side padding of x.
    batch2 = 20
    x2 = jax.random.normal(k_x2, (batch2, num_features), jnp.float32)
    ref2 = reference_forward(x2, params)
    out2 = semantic_pointer_network_tanh(x2, params, matmul_dtype=jnp.float32)
    out2 = jax.block_until_ready(out2)
    assert out2.shape == (batch2, dims)
    err2 = float(jnp.max(jnp.abs(out2 - ref2)))
    assert err2 < 2e-3, f"ragged-batch f32 path: max abs error {err2}"

    print("KERNEL_OK")
</pallas_src>

<mosaic_0001>
module attributes {stable_mosaic.version = 11 : i64} {
  func.func @_spn_tanh_kernel(%arg0: i32, %arg1: memref<8x32xf32, #tpu.memory_space<vmem>>, %arg2: memref<32x32xbf16, #tpu.memory_space<vmem>>, %arg3: memref<1x32xf32, #tpu.memory_space<vmem>>, %arg4: memref<32x32xbf16, #tpu.memory_space<vmem>>, %arg5: memref<1x32xf32, #tpu.memory_space<vmem>>, %arg6: memref<32x16xbf16, #tpu.memory_space<vmem>>, %arg7: memref<1x16xf32, #tpu.memory_space<vmem>>, %arg8: memref<8x16xf32, #tpu.memory_space<vmem>>) attributes {dimension_semantics = [#tpu.dimension_semantics<parallel>], iteration_bounds = array<i64: 1>, scalar_prefetch = 0 : i64, scratch_operands = 0 : i64, tpu.core_type = #tpu.core_type<tc>, window_params = [{transform_indices = @transform_0, window_bounds = array<i64: 8, 32>}, {pipeline_mode = #tpu.pipeline_mode<synchronous>, transform_indices = @transform_1, window_bounds = array<i64: 32, 32>}, {pipeline_mode = #tpu.pipeline_mode<synchronous>, transform_indices = @transform_2, window_bounds = array<i64: 1, 32>}, {pipeline_mode = #tpu.pipeline_mode<synchronous>, transform_indices = @transform_3, window_bounds = array<i64: 32, 32>}, {pipeline_mode = #tpu.pipeline_mode<synchronous>, transform_indices = @transform_4, window_bounds = array<i64: 1, 32>}, {pipeline_mode = #tpu.pipeline_mode<synchronous>, transform_indices = @transform_5, window_bounds = array<i64: 32, 16>}, {pipeline_mode = #tpu.pipeline_mode<synchronous>, transform_indices = @transform_6, window_bounds = array<i64: 1, 16>}, {transform_indices = @transform_7, window_bounds = array<i64: 8, 16>}]} {
    %c0 = arith.constant 0 : index
    %c0_0 = arith.constant 0 : index
    %0 = vector.load %arg1[%c0, %c0_0] : memref<8x32xf32, #tpu.memory_space<vmem>>, vector<8x32xf32>
    %1 = arith.truncf %0 : vector<8x32xf32> to vector<8x32xbf16>
    %c0_1 = arith.constant 0 : index
    %c0_2 = arith.constant 0 : index
    %2 = vector.load %arg2[%c0_1, %c0_2] : memref<32x32xbf16, #tpu.memory_space<vmem>>, vector<32x32xbf16>
    %cst = arith.constant dense<0.000000e+00> : vector<8x32xf32>
    %3 = tpu.matmul %1, %2, %cst {dimension_numbers = #tpu.dot_dimension_numbers<[1], [0], [0], [1], [0, 0, 1, 1], [], []>} : vector<8x32xbf16>, vector<32x32xbf16>, vector<8x32xf32> -> vector<8x32xf32>
    %c0_3 = arith.constant 0 : index
    %c0_4 = arith.constant 0 : index
    %4 = vector.load %arg3[%c0_3, %c0_4] : memref<1x32xf32, #tpu.memory_space<vmem>>, vector<1x32xf32>
    %5 = vector.broadcast %4 : vector<1x32xf32> to vector<8x32xf32>
    %6 = arith.addf %3, %5 : vector<8x32xf32>
    %cst_5 = arith.constant 0.00999999977 : f32
    %7 = vector.broadcast %cst_5 : f32 to vector<8x32xf32>
    %8 = arith.mulf %7, %6 : vector<8x32xf32>
    %9 = arith.maximumf %6, %8 : vector<8x32xf32>
    %10 = arith.truncf %9 : vector<8x32xf32> to vector<8x32xbf16>
    %c0_6 = arith.constant 0 : index
    %c0_7 = arith.constant 0 : index
    %11 = vector.load %arg4[%c0_6, %c0_7] : memref<32x32xbf16, #tpu.memory_space<vmem>>, vector<32x32xbf16>
    %cst_8 = arith.constant dense<0.000000e+00> : vector<8x32xf32>
    %12 = tpu.matmul %10, %11, %cst_8 {dimension_numbers = #tpu.dot_dimension_numbers<[1], [0], [0], [1], [0, 0, 1, 1], [], []>} : vector<8x32xbf16>, vector<32x32xbf16>, vector<8x32xf32> -> vector<8x32xf32>
    %c0_9 = arith.constant 0 : index
    %c0_10 = arith.constant 0 : index
    %13 = vector.load %arg5[%c0_9, %c0_10] : memref<1x32xf32, #tpu.memory_space<vmem>>, vector<1x32xf32>
    %14 = vector.broadcast %13 : vector<1x32xf32> to vector<8x32xf32>
    %15 = arith.addf %12, %14 : vector<8x32xf32>
    %cst_11 = arith.constant 0.00999999977 : f32
    %16 = vector.broadcast %cst_11 : f32 to vector<8x32xf32>
    %17 = arith.mulf %16, %15 : vector<8x32xf32>
    %18 = arith.maximumf %15, %17 : vector<8x32xf32>
    %19 = arith.truncf %18 : vector<8x32xf32> to vector<8x32xbf16>
    %c0_12 = arith.constant 0 : index
    %c0_13 = arith.constant 0 : index
    %20 = vector.load %arg6[%c0_12, %c0_13] : memref<32x16xbf16, #tpu.memory_space<vmem>>, vector<32x16xbf16>
    %cst_14 = arith.constant dense<0.000000e+00> : vector<8x16xf32>
    %21 = tpu.matmul %19, %20, %cst_14 {dimension_numbers = #tpu.dot_dimension_numbers<[1], [0], [0], [1], [0, 0, 1, 1], [], []>} : vector<8x32xbf16>, vector<32x16xbf16>, vector<8x16xf32> -> vector<8x16xf32>
    %c0_15 = arith.constant 0 : index
    %c0_16 = arith.constant 0 : index
    %22 = vector.load %arg7[%c0_15, %c0_16] : memref<1x16xf32, #tpu.memory_space<vmem>>, vector<1x16xf32>
    %23 = vector.broadcast %22 : vector<1x16xf32> to vector<8x16xf32>
    %24 = arith.addf %21, %23 : vector<8x16xf32>
    %25 = math.tanh %24 : vector<8x16xf32>
    %cst_17 = arith.constant 3.14159274 : f32
    %26 = vector.broadcast %cst_17 : f32 to vector<8x16xf32>
    %27 = arith.mulf %25, %26 : vector<8x16xf32>
    %c0_18 = arith.constant 0 : index
    %c0_19 = arith.constant 0 : index
    %28 = vector.load %arg8[%c0_18, %c0_19] : memref<8x16xf32, #tpu.memory_space<vmem>>, vector<8x16xf32>
    tpu.vector_store %arg8[%c0_18, %c0_19], %27 {strides = array<i32>} : memref<8x16xf32, #tpu.memory_space<vmem>>, vector<8x16xf32>,
    return
  }
  func.func @transform_0(%arg0: i32) -> (i32, i32) {
    %c0_i32 = arith.constant 0 : i32
    %c0_i32_0 = arith.constant 0 : i32
    return %arg0, %c0_i32 : i32, i32
  }
  func.func @transform_1(%arg0: i32) -> (i32, i32) {
    %c0_i32 = arith.constant 0 : i32
    %c0_i32_0 = arith.constant 0 : i32
    %c0_i32_1 = arith.constant 0 : i32
    return %c0_i32, %c0_i32_0 : i32, i32
  }
  func.func @transform_2(%arg0: i32) -> (i32, i32) {
    %c0_i32 = arith.constant 0 : i32
    %c0_i32_0 = arith.constant 0 : i32
    %c0_i32_1 = arith.constant 0 : i32
    return %c0_i32, %c0_i32_0 : i32, i32
  }
  func.func @transform_3(%arg0: i32) -> (i32, i32) {
    %c0_i32 = arith.constant 0 : i32
    %c0_i32_0 = arith.constant 0 : i32
    %c0_i32_1 = arith.constant 0 : i32
    return %c0_i32, %c0_i32_0 : i32, i32
  }
  func.func @transform_4(%arg0: i32) -> (i32, i32) {
    %c0_i32 = arith.constant 0 : i32
    %c0_i32_0 = arith.constant 0 : i32
    %c0_i32_1 = arith.constant 0 : i32
    return %c0_i32, %c0_i32_0 : i32, i32
  }
  func.func @transform_5(%arg0: i32) -> (i32, i32) {
    %c0_i32 = arith.constant 0 : i32
    %c0_i32_0 = arith.constant 0 : i32
    %c0_i32_1 = arith.constant 0 : i32
    return %c0_i32, %c0_i32_0 : i32, i32
  }
  func.func @transform_6(%arg0: i32) -> (i32, i32) {
    %c0_i32 = arith.constant 0 : i32
    %c0_i32_0 = arith.constant 0 : i32
    %c0_i32_1 = arith.constant 0 : i32
    return %c0_i32, %c0_i32_0 : i32, i32
  }
  func.func @transform_7(%arg0: i32) -> (i32, i32) {
    %c0_i32 = arith.constant 0 : i32
    %c0_i32_0 = arith.constant 0 : i32
    return %arg0, %c0_i32 : i32, i32
  }
}

</mosaic_0001>

<bundles_post_ra>
// kernel: tpu_custom_call.1
= control target key start
LH: loop header
LB: loop body
LE: loop exit
PB: predicated region body
PF: predicated region fallthrough
CT: control target
= control target key end

     0   :  { %12 = vsyncpa [#allocation3], 0  ;;  %s487_s0 = inlined_call_operand.vmem [shape: f32[8,32], index: 0, kind: input, shape index: {}]   ;;  %s488_s1 = inlined_call_operand.vmem [shape: bf16[32,32], index: 1, kind: input, shape index: {}]   ;;  %s489_s2 = inlined_call_operand.vmem [shape: f32[1,32], index: 2, kind: input, shape index: {}]   ;;  %s490_s3 = inlined_call_operand.hbm [shape: bf16[32,32], index: 3, kind: input, shape index: {}]   ;;  %s491_s4 = inlined_call_operand.hbm [shape: f32[1,32], index: 4, kind: input, shape index: {}]   ;;  %s492_s5 = inlined_call_operand.vmem [shape: bf16[32,16], index: 5, kind: input, shape index: {}]   ;;  %s493_s6 = inlined_call_operand.vmem [shape: f32[1,16], index: 6, kind: input, shape index: {}]   ;;  %s494_s7 = inlined_call_operand.hbm [shape: f32[8,16], index: 7, kind: output, shape index: {}]  }
   0x1   :  { %13 = vsyncpa [#allocation6], 0 }
   0x2   :  { %14 = vsyncpa [#allocation4], 0  ;;  %s407_s24 = smov [#allocation2]  }
   0x3   :  { %s26_s25 = sshll.u32 %s407_s24, 4  ;;  %s27_s25 = int_to_ptr.vmem [resolvable:$true] %s26_s25 }
   0x4   :  { %s349_s26 = scalar_lea.vmem %s27_s25, 256  ;;  %p354_p1 = scmp.lt.s32.totalorder %s27_s25, %s27_s25 }
   0x5   :  { %p350_p0 = scmp.ne.s32.totalorder %s27_s25, %s349_s26  ;;  %p355_p2 = scmp.lt.s32.totalorder %s349_s26, %s349_s26 }
   0x7   :  { %p356_p3 = por %p355_p2, %p354_p1 }
   0x9   :  { %p357_p4 = pnand %p356_p3, %p350_p0 }
   0xb   :  { %360 = shalt.err (!%p357_p4)
}
   0xc   :  { %s408_s27 = smov 64   ;;  %s409_s28 = smov 4  }
   0xd   :  { %32 = dma.hbm_to_vmem [thread:$0]  %s490_s3, 256, %s27_s25, [#allocation3], %s408_s27, %s408_s27, %s409_s28  }
   0xe   :  { %s410_s8 = smov [#allocation5]  }
   0xf   :  { %s39_s9 = sshll.u32 %s410_s8, 4  ;;  %s40_s9 = int_to_ptr.vmem [resolvable:$true] %s39_s9 }
  0x10   :  { %s369_s10 = scalar_lea.vmem %s40_s9, 16  ;;  %s373_s11 = scalar_lea.vmem %s40_s9, 32 }
  0x11   :  { %p370_p5 = scmp.ne.s32.totalorder %s40_s9, %s369_s10  ;;  %p374_p6 = scmp.lt.s32.totalorder %s40_s9, %s40_s9 }
  0x12   :  { %p375_p7 = scmp.lt.s32.totalorder %s373_s11, %s369_s10 }
  0x14   :  { %p376_p8 = por %p375_p7, %p374_p6 }
  0x16   :  { %p377_p9 = pnand %p376_p8, %p370_p5 }
  0x18   :  { %380 = shalt.err (!%p377_p9)
}
  0x19   :  { %42 = dma.hbm_to_vmem [thread:$0]  %s491_s4, 16, %s40_s9, [#allocation6]  }
  0x1a   :  { %401 = dma.done.wait [#allocation3], 256  }
  0x1b   :  { %402 = vsyncadd [#allocation3], 4294967040 }
  0x1c   :  { %403 = dma.done.wait [#allocation6], 16  }
  0x1d   :  { %404 = vsyncadd [#allocation6], 4294967280  ;;  %v411_v0 = vmov 0.0   ;;  %vm412_vm0 = vmmov 0   ;;  %v333_v1 = vld [vmem:[%s488_s1 + $0x8] sm:$0xff]   ;;  %v334_v2 = vld [vmem:[%s488_s1] sm:$0xff]  }
  0x1e   :  { %302 = vmatprep.subr.bf16.mxu0 %v411_v0  ;;  %306 = vmatprep.mubr.msk.bf16.mxu0 %vm412_vm0, %v411_v0  ;;  %v54_v3 = vld [vmem:[%s487_s0] sm:$0xff]  ;;  %vm79_vm1 = vcmask 261120   ;;  %v335_v5 = vld [vmem:[#allocation2 + $0x8] sm:$0xff]   ;;  %v285_v18 = vld [vmem:[#allocation5] ss:$0 sm:$0xff]  ;;  %vm263_vm2 = vcmask 130048  }
  0x1f   :  { %310 = vmatprep.subr.bf16.mxu1 %v411_v0  ;;  %314 = vmatprep.mubr.msk.bf16.mxu1 %vm412_vm0, %v411_v0  ;;  %v55_v4 = vpack.c.bf16 %v54_v3, %v54_v3  ;;  %v336_v6 = vld [vmem:[#allocation2] sm:$0xff]   ;;  %v337_v16 = vld [vmem:[%s492_s5 + $0x8] sm:$0xff]  }
  0x20   :  { %303 = vmatpush3.bf16.msra.mxu0 %v333_v1  ;;  %311 = vmatpush3.bf16.msra.mxu1 %v335_v5  ;;  %v281_v7 = vld [vmem:[%s489_s2] ss:$0 sm:$0xff] }
  0x21   :  { %304 = vmatprep.subr.bf16.mxu0 %v411_v0  ;;  %312 = vmatprep.subr.bf16.mxu1 %v411_v0  ;;  %v338_v17 = vld [vmem:[%s492_s5] sm:$0xff]   ;;  %s413_s5 = smov [#allocation7]  }
  0x22   :  { %v289_v27 = vld [vmem:[%s493_s6] ss:$0 sm:$0xff]  ;;  %s271_s23 = sshll.u32 %s413_s5, 4  ;;  %s272_s23 = int_to_ptr.vmem [resolvable:$true] %s271_s23 }
  0x23   :  { %s381_s24 = scalar_lea.vmem %s272_s23, 128  ;;  %p386_p11 = scmp.lt.s32.totalorder %s272_s23, %s272_s23 }
  0x24   :  { %305 = vmatpush3.bf16.msra.mxu0 %v334_v2  ;;  %313 = vmatpush3.bf16.msra.mxu1 %v336_v6  ;;  %p382_p10 = scmp.ne.s32.totalorder %s272_s23, %s381_s24  ;;  %p387_p12 = scmp.lt.s32.totalorder %s381_s24, %s381_s24 }
  0x25   :  { %318 = vmatprep.subr.bf16.mxu0 %v411_v0 }
  0x26   :  { %p388_p13 = por %p387_p12, %p386_p11 }
  0x27   :  { %307 = vmatmul.mubr.msk.bf16.vlgmr.msra.gmra.mxu0 %vm79_vm1, %v55_v4 }
  0x28   :  { %322 = vmatprep.mubr.msk.bf16.mxu0 %vm412_vm0, %v411_v0  ;;  %319 = vmatpush3.bf16.msra.mxu0 %v337_v16  ;;  %p389_p0 = pnand %p388_p13, %p382_p10 }
  0x29   :  { %320 = vmatprep.subr.bf16.mxu0 %v411_v0 }
  0x2c   :  { %321 = vmatpush3.bf16.msra.mxu0 %v338_v17 }
  0xe7   :  { %v117_v8 = vpop.f32.mrf.mxu0 }
  0xe8   :  { %v118_v9 = vadd.f32 %v281_v7, %v117_v8 }
  0xe9   :  { %v308_v10 = vpop.f32.mrf.mxu0 }
  0xea   :  { %v123_v11 = vmul.f32 0.01, %v118_v9 }
  0xeb   :  { %v120_v12 = vpop.f32.mrf.mxu0 }
  0xec   :  { %v124_v13 = vmax.f32 %v118_v9, %v123_v11 }
  0xed   :  { %v309_v14 = vpop.f32.mrf.mxu0 }
  0xee   :  { %v125_v15 = vpack.c.bf16 %v124_v13, %v124_v13 }
  0xf0   :  { %315 = vmatmul.mubr.msk.bf16.vlgmr.msra.gmra.mxu1 %vm79_vm1, %v125_v15 }
 0x1b0   :  { %v186_v19 = vpop.f32.mrf.mxu1 }
 0x1b1   :  { %v187_v20 = vadd.f32 %v285_v18, %v186_v19 }
 0x1b2   :  { %v316_v21 = vpop.f32.mrf.mxu1 }
 0x1b3   :  { %v192_v22 = vmul.f32 0.01, %v187_v20 }
 0x1b4   :  { %v189_v23 = vpop.f32.mrf.mxu1 }
 0x1b5   :  { %v193_v24 = vmax.f32 %v187_v20, %v192_v22 }
 0x1b6   :  { %v317_v25 = vpop.f32.mrf.mxu1 }
 0x1b7   :  { %v194_v26 = vpack.c.bf16 %v193_v24, %v193_v24 }
 0x1b9   :  { %323 = vmatmul.mubr.msk.bf16.vlgmr.msra.gmra.mxu0 %vm79_vm1, %v194_v26 }
 0x279   :  { %v255_v28 = vpop.f32.mrf.mxu0 }
 0x27a   :  { %v256_v29 = vadd.f32 %v289_v27, %v255_v28 }
 0x27b   :  { %v324_v30 = vpop.f32.mrf.mxu0 }
 0x27c   :  { %339 = vtanh.f32 %v256_v29 }
 0x27d   :  { %v258_v31 = vpop.f32.mrf.mxu0 }
 0x27f   :  { %v325_v32 = vpop.f32.mrf.mxu0 }
 0x289   :  { %v340_v33 = vpop.eup %339 }
 0x28a   :  { %v262_v34 = vmul.f32 3.1415927, %v340_v33 }
 0x28c   :  { %264 = vst.msk [vmem:[#allocation7] sm:$0xff] %vm263_vm2, %v262_v34 }
 0x28d   :  { %392 = shalt.err (!%p389_p0)
}
 0x28e   :  { %274 = dma.vmem_to_hbm [thread:$0]  %s272_s23, 128, %s494_s7, [#allocation4]  }
 0x28f   :  { %405 = dma.done.wait [#allocation4], 128  }
 0x290   :  { %406 = vsyncadd [#allocation4], 4294967168 }
 0x291   :  { %278 = vsyncpa [#allocation3], 1 }
 0x292   :  { %279 = vsyncpa [#allocation6], 1 }
 0x293   :  { %280 = vsyncpa [#allocation4], 1 }

</bundles_post_ra>
